<compile_context>
chip_gen: v6e
topology: v6e:2x2x1
jax: 0.10.0
libtpu: 0.0.40
codegen_flags: <defaults>
</compile_context>

<pallas_src>
import jax
import jax.numpy as jnp
from jax.experimental import pallas as pl
from jax.experimental.pallas import tpu as pltpu


def _embedding_onehot_kernel(ids_ref, table_ref, out_ref):
    """One-hot MXU gather of TM embedding rows.

    ids_ref   : (TM, 1) int32 token ids for this tile (VMEM)
    table_ref : (V, E_pad) embedding table, resident in VMEM (constant block)
    out_ref   : (TM, E_pad) output tile
    """
    tm = out_ref.shape[0]
    v = table_ref.shape[0]
    ids = ids_ref[...]                                             # (TM, 1)
    col = jax.lax.broadcasted_iota(jnp.int32, (tm, v), 1)          # (TM, V)
    one_hot = (col == ids).astype(table_ref.dtype)                 # exact 0/1
    out_ref[...] = jnp.dot(
        one_hot, table_ref[...], preferred_element_type=jnp.float32
    ).astype(out_ref.dtype)


def _embedding_take_kernel(ids_ref, table_ref, out_ref):
    """Whole-tile vector gather (used when V is too large for one-hot)."""
    ids = ids_ref[...][:, 0]                                       # (TM,)
    out_ref[...] = jnp.take(table_ref[...], ids, axis=0).astype(out_ref.dtype)


def embedding_forward(input_seqs, table, *, tm=512, out_dtype=None):
    """input_seqs: int array (...,) of token ids. table: (V, E) float table.

    Returns (..., E) embeddings.  Dropout is identity (eval mode).
    """
    # TODO(synk): training-mode dropout (stochastic mask via pltpu.prng_*) is
    # not implemented; this matches the module's eval-mode forward.
    orig_shape = input_seqs.shape
    v, e = table.shape
    out_dtype = table.dtype if out_dtype is None else out_dtype

    ids = input_seqs.reshape(-1).astype(jnp.int32)
    ids = jnp.clip(ids, 0, v - 1)          # bounds safety: OOB VMEM is unchecked
    n = ids.shape[0]

    # Large tiles amortise the ~0.35 us per-grid-step overhead, but keep the
    # tile no larger than the (rounded) input for tiny calls.
    tm = max(8, min(tm, pl.next_power_of_2(max(n, 1))))
    tm = ((tm + 7) // 8) * 8
    n_pad = pl.cdiv(n, tm) * tm
    if n_pad != n:
        # pad with id 0 == padding_idx (gathers the all-zeros row, discarded)
        ids = jnp.pad(ids, (0, n_pad - n))
    ids2d = ids.reshape(n_pad, 1)

    # Lane-dense output: pad E to a multiple of 128 once (layout plumbing).
    e_pad = ((e + 127) // 128) * 128
    table_p = table if e_pad == e else jnp.pad(table, ((0, 0), (0, e_pad - e)))

    # TODO(synk): tables too large to keep resident in VMEM (notably on v7x's
    # 64 MiB/TC) need a manual double-buffered DMA row-gather with
    # memory_space=pl.ANY; MAWPS-scale vocabularies fit easily, so that path
    # is not implemented here.
    use_onehot = v <= 2048
    kernel = _embedding_onehot_kernel if use_onehot else _embedding_take_kernel

    # Right-size the scoped VMEM request instead of asking for 64 MiB.
    itemsize_out = jnp.dtype(out_dtype).itemsize
    table_bytes = v * e_pad * table_p.dtype.itemsize
    out_tile_bytes = tm * e_pad * itemsize_out
    onehot_bytes = tm * v * 4 if use_onehot else 0
    vmem_needed = (2 * table_bytes + 3 * out_tile_bytes + onehot_bytes
                   + 4 * tm * 4 + (4 << 20))
    vmem_limit = int(min(max(vmem_needed, 8 << 20), 60 << 20))

    out = pl.pallas_call(
        kernel,
        out_shape=jax.ShapeDtypeStruct((n_pad, e_pad), out_dtype),
        grid_spec=pltpu.PrefetchScalarGridSpec(
            num_scalar_prefetch=0,
            grid=(n_pad // tm,),
            in_specs=[
                # Per-step tile of token ids (VMEM int32 block).
                pl.BlockSpec((tm, 1), lambda i: (i, 0)),
                # Whole table as one constant block: fetched once, stays in VMEM.
                pl.BlockSpec((v, e_pad), lambda i: (0, 0)),
            ],
            # If profiling ever shows exposed output writeback, add
            # pipeline_mode=pl.Buffered(3) here.
            out_specs=pl.BlockSpec((tm, e_pad), lambda i: (i, 0)),
        ),
        compiler_params=pltpu.CompilerParams(
            dimension_semantics=("parallel",),
            vmem_limit_bytes=vmem_limit,
        ),
    )(ids2d, table_p)

    out = out[:n, :e]
    return out.reshape(*orig_shape, e)


def init_embedding_table(key, input_size, embedding_size, padding_idx=0):
    """PyTorch nn.Embedding init: N(0,1), padding_idx row zeroed."""
    table = jax.random.normal(key, (input_size, embedding_size), jnp.float32)
    table = table.at[padding_idx].set(0.0)
    return table


if __name__ == "__main__":
    key = jax.random.PRNGKey(0)
    k_ids, k_tab, k_tab2 = jax.random.split(key, 3)

    batch = 2
    seq_len = 8
    input_size = 64        # vocab
    embedding_size = 128   # lane-aligned embedding dim

    input_seqs = jax.random.randint(
        k_ids, (batch, seq_len), minval=0, maxval=input_size, dtype=jnp.int32
    )
    # Make sure padding_idx=0 appears at least once.
    input_seqs = input_seqs.at[0, 0].set(0)

    table = init_embedding_table(k_tab, input_size, embedding_size)
    out = jax.block_until_ready(embedding_forward(input_seqs, table))

    # Pure-JAX reference: embedding lookup (dropout is identity in eval mode).
    ref = jnp.take(table, input_seqs, axis=0)
    assert out.shape == (batch, seq_len, embedding_size)
    assert jnp.allclose(out, ref)
    # padding_idx=0 rows must be exactly zero.
    assert jnp.all(out[0, 0] == 0.0)

    # Second check: non-lane-aligned embedding dim exercises the E-padding path.
    e2 = 96
    table2 = init_embedding_table(k_tab2, input_size, e2)
    out2 = jax.block_until_ready(embedding_forward(input_seqs, table2))
    ref2 = jnp.take(table2, input_seqs, axis=0)
    assert out2.shape == (batch, seq_len, e2)
    assert jnp.allclose(out2, ref2)

    print("KERNEL_OK")
</pallas_src>

<mosaic_0001>
module attributes {stable_mosaic.version = 11 : i64} {
  func.func @_embedding_onehot_kernel(%arg0: i32, %arg1: memref<16x1xi32, #tpu.memory_space<vmem>>, %arg2: memref<64x128xf32, #tpu.memory_space<vmem>>, %arg3: memref<16x128xf32, #tpu.memory_space<vmem>>) attributes {dimension_semantics = [#tpu.dimension_semantics<parallel>], iteration_bounds = array<i64: 1>, scalar_prefetch = 0 : i64, scratch_operands = 0 : i64, tpu.core_type = #tpu.core_type<tc>, window_params = [{transform_indices = @transform_0, window_bounds = array<i64: 16, 1>}, {pipeline_mode = #tpu.pipeline_mode<synchronous>, transform_indices = @transform_1, window_bounds = array<i64: 64, 128>}, {transform_indices = @transform_2, window_bounds = array<i64: 16, 128>}]} {
    %c0 = arith.constant 0 : index
    %c0_0 = arith.constant 0 : index
    %0 = vector.load %arg1[%c0, %c0_0] : memref<16x1xi32, #tpu.memory_space<vmem>>, vector<16x1xi32>
    %1 = tpu.iota {dimensions = array<i32: 1>} : vector<16x64xi32>
    %2 = vector.broadcast %0 : vector<16x1xi32> to vector<16x64xi32>
    %3 = arith.cmpi eq, %1, %2 : vector<16x64xi32>
    %4 = arith.extui %3 : vector<16x64xi1> to vector<16x64xi32>
    %5 = arith.sitofp %4 : vector<16x64xi32> to vector<16x64xf32>
    %c0_1 = arith.constant 0 : index
    %c0_2 = arith.constant 0 : index
    %6 = vector.load %arg2[%c0_1, %c0_2] : memref<64x128xf32, #tpu.memory_space<vmem>>, vector<64x128xf32>
    %cst = arith.constant dense<0.000000e+00> : vector<16x128xf32>
    %7 = tpu.matmul %5, %6, %cst {dimension_numbers = #tpu.dot_dimension_numbers<[1], [0], [0], [1], [0, 0, 1, 1], [], []>} : vector<16x64xf32>, vector<64x128xf32>, vector<16x128xf32> -> vector<16x128xf32>
    %c0_3 = arith.constant 0 : index
    %c0_4 = arith.constant 0 : index
    %8 = vector.load %arg3[%c0_3, %c0_4] : memref<16x128xf32, #tpu.memory_space<vmem>>, vector<16x128xf32>
    tpu.vector_store %arg3[%c0_3, %c0_4], %7 {strides = array<i32>} : memref<16x128xf32, #tpu.memory_space<vmem>>, vector<16x128xf32>,
    return
  }
  func.func @transform_0(%arg0: i32) -> (i32, i32) {
    %c0_i32 = arith.constant 0 : i32
    %c0_i32_0 = arith.constant 0 : i32
    return %arg0, %c0_i32 : i32, i32
  }
  func.func @transform_1(%arg0: i32) -> (i32, i32) {
    %c0_i32 = arith.constant 0 : i32
    %c0_i32_0 = arith.constant 0 : i32
    %c0_i32_1 = arith.constant 0 : i32
    return %c0_i32, %c0_i32_0 : i32, i32
  }
  func.func @transform_2(%arg0: i32) -> (i32, i32) {
    %c0_i32 = arith.constant 0 : i32
    %c0_i32_0 = arith.constant 0 : i32
    return %arg0, %c0_i32 : i32, i32
  }
}

</mosaic_0001>

<bundles_post_ra>
// kernel: tpu_custom_call.1
= control target key start
LH: loop header
LB: loop body
LE: loop exit
PB: predicated region body
PF: predicated region fallthrough
CT: control target
= control target key end

     0   :  { %7 = vsyncpa [#allocation3], 0  ;;  %s274_s0 = inlined_call_operand.vmem [shape: s32[16,1], index: 0, kind: input, shape index: {}]   ;;  %s275_s1 = inlined_call_operand.hbm [shape: f32[64,128], index: 1, kind: input, shape index: {}]   ;;  %s276_s2 = inlined_call_operand.hbm [shape: f32[16,128], index: 2, kind: output, shape index: {}]  }
   0x1   :  { %8 = vsyncpa [#allocation4], 0  ;;  %s235_s9 = smov [#allocation2]  }
   0x2   :  { %s16_s10 = sshll.u32 %s235_s9, 4  ;;  %s17_s10 = int_to_ptr.vmem [resolvable:$true] %s16_s10 }
   0x3   :  { %s199_s11 = scalar_lea.vmem %s17_s10, 1024  ;;  %p204_p1 = scmp.lt.s32.totalorder %s17_s10, %s17_s10 }
   0x4   :  { %p200_p0 = scmp.ne.s32.totalorder %s17_s10, %s199_s11  ;;  %p205_p2 = scmp.lt.s32.totalorder %s199_s11, %s199_s11 }
   0x6   :  { %p206_p3 = por %p205_p2, %p204_p1 }
   0x8   :  { %p207_p4 = pnand %p206_p3, %p200_p0 }
   0xa   :  { %210 = shalt.err (!%p207_p4)
}
   0xb   :  { %s236_s12 = smov 128   ;;  %s237_s13 = smov 8  }
   0xc   :  { %22 = dma.hbm_to_vmem [thread:$0]  %s275_s1, 1024, %s17_s10, [#allocation3], %s236_s12, %s236_s12, %s237_s13  }
   0xd   :  { %231 = dma.done.wait [#allocation3], 1024  }
   0xe   :  { %232 = vsyncadd [#allocation3], 4294966272  ;;  %v238_v0 = vmov 0   ;;  %v26_v1 = vld [vmem:[%s274_s0] sm:$0xff]  ;;  %v49_v2 = vld [vmem:[#allocation2 + $0x38] sm:$0xff]  ;;  %v28_v11 = vlaneseq  ;;  %vm50_vm0 = vcmask 523264  }
   0xf   :  { %190 = vset.pattern.permute.xlu0 %v238_v0  ;;  %165 = vmatprep.subr.mxu0 %v49_v2  ;;  %v48_v3 = vld [vmem:[#allocation2 + $0x30] sm:$0xff]  ;;  %v27_v4 = vld [vmem:[%s274_s0 + $0x8] sm:$0xff]  ;;  %v46_v6 = vld [vmem:[#allocation2 + $0x20] sm:$0xff]  ;;  %v239_v14 = vmov 0.0   ;;  %s240_s0 = smov [#allocation5]  }
  0x10   :  { %31 = vperm.xlu0 %190, %v26_v1   ;;  %166 = vmatpush3.msra.mxu0 %v49_v2  ;;  %v47_v5 = vld [vmem:[#allocation2 + $0x28] sm:$0xff]  ;;  %v45_v7 = vld [vmem:[#allocation2 + $0x18] sm:$0xff]  ;;  %v44_v8 = vld [vmem:[#allocation2 + $0x10] sm:$0xff]  ;;  %v29_v12 = vand.u32 127, %v28_v11  ;;  %s139_s1 = sshll.u32 %s240_s0, 4  ;;  %s140_s1 = int_to_ptr.vmem [resolvable:$true] %s139_s1 }
  0x11   :  { %167 = vmatprep.subr.mxu0 %v48_v3  ;;  %v43_v9 = vld [vmem:[#allocation2 + $0x8] sm:$0xff]  ;;  %v42_v10 = vld [vmem:[#allocation2] sm:$0xff]  ;;  %s211_s20 = scalar_lea.vmem %s140_s1, 256  ;;  %p216_p6 = scmp.lt.s32.totalorder %s140_s1, %s140_s1 }
  0x12   :  { %168 = vmatpush3.msra.mxu0 %v48_v3  ;;  %p212_p5 = scmp.ne.s32.totalorder %s140_s1, %s211_s20  ;;  %p217_p7 = scmp.lt.s32.totalorder %s211_s20, %s211_s20 }
  0x13   :  { %169 = vmatprep.subr.mxu0 %v47_v5 }
  0x14   :  { %34 = vperm.xlu0 %190, %v27_v4   ;;  %170 = vmatpush3.msra.mxu0 %v47_v5  ;;  %p218_p8 = por %p217_p7, %p216_p6 }
  0x15   :  { %171 = vmatprep.subr.mxu0 %v46_v6 }
  0x16   :  { %172 = vmatpush3.msra.mxu0 %v46_v6  ;;  %p219_p9 = pnand %p218_p8, %p212_p5 }
  0x17   :  { %173 = vmatprep.subr.mxu0 %v45_v7 }
  0x18   :  { %174 = vmatpush3.msra.mxu0 %v45_v7 }
  0x19   :  { %175 = vmatprep.subr.mxu0 %v44_v8 }
  0x1a   :  { %176 = vmatpush3.msra.mxu0 %v44_v8 }
  0x1b   :  { %177 = vmatprep.subr.mxu0 %v43_v9 }
  0x1c   :  { %178 = vmatpush3.msra.mxu0 %v43_v9 }
  0x1d   :  { %179 = vmatprep.subr.mxu0 %v42_v10 }
  0x1e   :  { %180 = vmatpush3.msra.mxu0 %v42_v10 }
  0x8b   :  { %v32_v13 = vpop.permute.xlu0 %31 }
  0x8c   :  { %vm36_vm1 = vcmp.eq.s32.totalorder %v29_v12, %v32_v13 }
  0x8d   :  { %v151_v15 = vsel %vm36_vm1, 1.0, %v239_v14 }
  0x8e   :  { %181 = vmatprep.mubr.msk.f32.mxu0 %vm50_vm0, %v151_v15 }
  0x8f   :  { %v35_v16 = vpop.permute.xlu0 %34 }
  0x90   :  { %vm37_vm2 = vcmp.eq.s32.totalorder %v29_v12, %v35_v16 }
  0x91   :  { %v152_v17 = vsel %vm37_vm2, 1.0, %v239_v14 }
  0x92   :  { %182 = vmatmul.mubr.msk.f32.vlgmr.msra.gmra.mxu0 %vm50_vm0, %v152_v17 }
 0x152   :  { %v183_v18 = vpop.f32.mrf.mxu0 }
 0x153   :  { %133 = vst [vmem:[#allocation5 + $0x8] sm:$0xff] %v183_v18 }
 0x154   :  { %v123_v19 = vpop.f32.mrf.mxu0 }
 0x155   :  { %132 = vst [vmem:[#allocation5] sm:$0xff] %v123_v19 }
 0x156   :  { %222 = shalt.err (!%p219_p9)
}
 0x157   :  { %145 = dma.vmem_to_hbm [thread:$0]  %s140_s1, 256, %s276_s2, [#allocation4], %s236_s12, %s236_s12, %s237_s13  }
 0x158   :  { %233 = dma.done.wait [#allocation4], 256  }
 0x159   :  { %234 = vsyncadd [#allocation4], 4294967040 }
 0x15a   :  { %149 = vsyncpa [#allocation3], 1 }
 0x15b   :  { %150 = vsyncpa [#allocation4], 1 }

</bundles_post_ra>
